<compile_context>
chip_gen: v5e
topology: v5e:2x2
jax: 0.10.0
libtpu: 0.0.40
codegen_flags: <defaults>
</compile_context>

<pallas_src>
import math
import functools

import jax
import jax.numpy as jnp
from jax import lax
from jax.experimental import pallas as pl
from jax.experimental.pallas import tpu as pltpu

INF = 1e10
EPS = 1e-6  # layer_norm_epsilon

VMEM_LIMIT = 32 * 1024 * 1024  # safe on v5e/v6e (128 MiB) and v7x (64 MiB)


def _layernorm(x, w, b):
    # torch reference: u = mean, s = (x-u).std() (unbiased, ddof=1),
    # (x-u)/(s+eps)*w + b
    u = jnp.mean(x, axis=-1, keepdims=True)
    d = x - u
    var = jnp.sum(d * d, axis=-1, keepdims=True) / (x.shape[-1] - 1)
    s = jnp.sqrt(var)
    return w * (d / (s + EPS)) + b


def _gelu(x):
    return 0.5 * x * (1.0 + jnp.tanh(math.sqrt(2.0 / math.pi) *
                                     (x + 0.044715 * x * x * x)))


# ---------------------------------------------------------------------------
# Fused transformer block: LN1 -> fused QKV -> relative causal attention ->
# c_proj -> residual -> LN2 -> fc -> gelu -> proj -> residual.
# One grid step = one batch element; residual stream stays in VMEM.
# ---------------------------------------------------------------------------
def block_kernel(x_ref, rel_ref, ln1w, ln1b, wqkv, bqkv, wo, bo,
                 ln2w, ln2b, wfc, bfc, wpr, bpr, out_ref, *, n_head, d_head):
    x = x_ref[0]                                      # (T, E) f32
    T, E = x.shape

    # ----- attention half -----
    h1 = _layernorm(x, ln1w[...], ln1b[...]).astype(jnp.bfloat16)

    # Fused c_attn: single full-E contraction on the MXU.
    qkv = jnp.dot(h1, wqkv[...], preferred_element_type=jnp.float32) + bqkv[...]
    qkv = qkv.astype(jnp.bfloat16)                    # (T, 3E)

    # Split into per-head (H, T, d_head) operands (static lane slices + stack).
    q3 = jnp.stack([qkv[:, h * d_head:(h + 1) * d_head]
                    for h in range(n_head)], axis=0)
    k3 = jnp.stack([qkv[:, E + h * d_head:E + (h + 1) * d_head]
                    for h in range(n_head)], axis=0)
    v3 = jnp.stack([qkv[:, 2 * E + h * d_head:2 * E + (h + 1) * d_head]
                    for h in range(n_head)], axis=0)

    # Head-batched QK^T (scale=True in GPT2Model).
    scale = 1.0 / math.sqrt(d_head)
    w = jnp.einsum('hqd,hkd->hqk', q3, k3,
                   preferred_element_type=jnp.float32)          # (H, T, T) f32
    rel = rel_ref[0].astype(jnp.float32)                        # (H, T, T)

    # Causal mask (nd == ns) + additive relative bias, single select:
    # unmasked -> w*scale + rel ; masked -> -INF   (matches reference
    # (w + rel*b)*b - INF*(1-b)).
    rows = lax.broadcasted_iota(jnp.int32, (T, T), 0)
    cols = lax.broadcasted_iota(jnp.int32, (T, T), 1)
    causal = (rows >= cols)[None]                               # (1, T, T) bool
    w = jnp.where(causal, w * scale + rel, -INF)

    # Softmax (f32), reciprocal on the EUP.
    w = w - jnp.max(w, axis=-1, keepdims=True)
    p = jnp.exp(w)
    p = p * pl.reciprocal(jnp.sum(p, axis=-1, keepdims=True), approx=True)

    # Head-batched PV, merge heads, one full-E c_proj matmul, residual 1.
    ret = jnp.einsum('hqk,hkd->hqd', p.astype(jnp.bfloat16), v3,
                     preferred_element_type=jnp.float32)        # (H, T, dh)
    merged = jnp.concatenate([ret[h] for h in range(n_head)], axis=-1)  # (T, E)
    a = jnp.dot(merged.astype(jnp.bfloat16), wo[...],
                preferred_element_type=jnp.float32) + bo[...]
    x1 = x + a

    # ----- MLP half -----
    h2 = _layernorm(x1, ln2w[...], ln2b[...]).astype(jnp.bfloat16)
    hm = jnp.dot(h2, wfc[...], preferred_element_type=jnp.float32) + bfc[...]
    hm = _gelu(hm).astype(jnp.bfloat16)
    m = jnp.dot(hm, wpr[...], preferred_element_type=jnp.float32) + bpr[...]
    out_ref[0] = x1 + m                               # residual 2


def run_block(hidden, rel_bf16, blk, *, n_head, d_head):
    B, T, E = hidden.shape

    def full(shp):
        return pl.BlockSpec(shp, lambda b: (0,) * len(shp))

    kernel = functools.partial(block_kernel, n_head=n_head, d_head=d_head)
    return pl.pallas_call(
        kernel,
        out_shape=jax.ShapeDtypeStruct((B, T, E), jnp.float32),
        grid=(B,),
        in_specs=[
            pl.BlockSpec((1, T, E), lambda b: (b, 0, 0)),
            pl.BlockSpec((1, n_head, T, T), lambda b: (b, 0, 0, 0)),
            full((1, E)), full((1, E)),
            full((E, 3 * E)), full((1, 3 * E)),
            full((E, E)), full((1, E)),
            full((1, E)), full((1, E)),
            full((E, 4 * E)), full((1, 4 * E)),
            full((4 * E, E)), full((1, E)),
        ],
        out_specs=pl.BlockSpec((1, T, E), lambda b: (b, 0, 0)),
        compiler_params=pltpu.CompilerParams(
            dimension_semantics=("parallel",),
            vmem_limit_bytes=VMEM_LIMIT),
    )(hidden, rel_bf16,
      blk['ln1_w'], blk['ln1_b'], blk['w_attn'], blk['b_attn'],
      blk['w_proj'], blk['b_proj'],
      blk['ln2_w'], blk['ln2_b'], blk['w_fc'], blk['b_fc'],
      blk['w_pr'], blk['b_pr'])


# ---------------------------------------------------------------------------
# Final LayerNorm fused with the (merged, weight-tied) LM heads.
# Grid = (B, num_vocab_tiles); LN is computed once per batch element into a
# persistent VMEM scratch at vocab-tile 0 and reused for every vocab tile.
# ---------------------------------------------------------------------------
def lm_head_kernel(x_ref, lnw, lnb, w_ref, out_ref, hnorm):
    @pl.when(pl.program_id(1) == 0)
    def _():
        hnorm[...] = _layernorm(x_ref[0], lnw[...], lnb[...]).astype(jnp.bfloat16)

    # w_ref is (tv, E) bf16, untransposed; contract over E.
    out_ref[0] = lax.dot_general(hnorm[...], w_ref[...], (((1,), (1,)), ((), ())),
                                 preferred_element_type=jnp.float32)


def run_lm_heads(hidden, lnf_w, lnf_b, w_all_bf16):
    B, T, E = hidden.shape
    Vp = w_all_bf16.shape[0]                           # multiple of 128
    tv = 512 if Vp % 512 == 0 else (256 if Vp % 256 == 0 else 128)
    nv = Vp // tv
    return pl.pallas_call(
        lm_head_kernel,
        out_shape=jax.ShapeDtypeStruct((B, T, Vp), jnp.float32),
        grid=(B, nv),
        in_specs=[pl.BlockSpec((1, T, E), lambda b, v: (b, 0, 0)),
                  pl.BlockSpec((1, E), lambda b, v: (0, 0)),
                  pl.BlockSpec((1, E), lambda b, v: (0, 0)),
                  pl.BlockSpec((tv, E), lambda b, v: (v, 0))],
        out_specs=pl.BlockSpec((1, T, tv), lambda b, v: (b, 0, v)),
        scratch_shapes=[pltpu.VMEM((T, E), jnp.bfloat16)],
        compiler_params=pltpu.CompilerParams(
            dimension_semantics=("parallel", "arbitrary"),
            vmem_limit_bytes=VMEM_LIMIT),
    )(hidden, lnf_w, lnf_b, w_all_bf16)


# ---------------------------------------------------------------------------
# Parameter init (deterministic, synthetic) and end-to-end forward.
# ---------------------------------------------------------------------------
def _pad128(v):
    return ((v + 127) // 128) * 128


def _pad_rows(x, multiple=128):
    v = x.shape[0]
    vp = _pad128(v) if multiple == 128 else ((v + multiple - 1) // multiple) * multiple
    if vp == v:
        return x
    return jnp.pad(x, ((0, vp - v), (0, 0)))


def init_params(key, *, n_layer, n_embd, n_head, types_vocab, values_vocab,
                rel_vocab):
    ff = 4 * n_embd

    def nrm(k, shp, dtype=jnp.float32):
        return (0.02 * jax.random.normal(k, shp)).astype(dtype)

    keys = jax.random.split(key, 2 + n_layer)
    wte_types = nrm(keys[0], (types_vocab, n_embd))
    wte_values = nrm(keys[1], (values_vocab, n_embd))
    # Weight-tied LM heads: bf16, rows of each table padded to a 128 multiple
    # (lane-dense logit tiles), then concatenated so both heads run in one
    # vocab-tiled kernel.
    head_all = jnp.concatenate(
        [_pad_rows(wte_types.astype(jnp.bfloat16)),
         _pad_rows(wte_values.astype(jnp.bfloat16))], axis=0)
    params = {
        'wte_types': wte_types,
        'wte_values': wte_values,
        'wte_head_all': head_all,
        'lnf_w': jnp.ones((1, n_embd), jnp.float32),
        'lnf_b': jnp.zeros((1, n_embd), jnp.float32),
        'blocks': [],
    }
    for l in range(n_layer):
        ks = jax.random.split(keys[2 + l], 5)
        blk = {
            'ln1_w': jnp.ones((1, n_embd), jnp.float32),
            'ln1_b': jnp.zeros((1, n_embd), jnp.float32),
            # fused c_attn weight (E, 3E): [q | k | v] along the output axis
            'w_attn': nrm(ks[0], (n_embd, 3 * n_embd), jnp.bfloat16),
            'b_attn': jnp.zeros((1, 3 * n_embd), jnp.float32),
            'w_proj': nrm(ks[1], (n_embd, n_embd), jnp.bfloat16),
            'b_proj': jnp.zeros((1, n_embd), jnp.float32),
            'ln2_w': jnp.ones((1, n_embd), jnp.float32),
            'ln2_b': jnp.zeros((1, n_embd), jnp.float32),
            'w_fc': nrm(ks[2], (n_embd, ff), jnp.bfloat16),
            'b_fc': jnp.zeros((1, ff), jnp.float32),
            'w_pr': nrm(ks[3], (ff, n_embd), jnp.bfloat16),
            'b_pr': jnp.zeros((1, n_embd), jnp.float32),
            # nn.Embedding(rel_vocab, n_head), shipped as bf16 (halved DMA)
            'rel_w': nrm(ks[4], (rel_vocab, n_head), jnp.bfloat16),
        }
        params['blocks'].append(blk)
    return params


def transformer_forward(params, types_ids, values_ids, rel_ids, *, n_head):
    E = params['wte_values'].shape[1]
    d_head = E // n_head
    Vt = params['wte_types'].shape[0]
    Vv = params['wte_values'].shape[0]
    Vt_p = _pad128(Vt)

    # Embedding gathers are glue (plain JAX); all dense compute runs in Pallas.
    types_emb = params['wte_types'][types_ids]           # (B, T, E)
    values_emb = params['wte_values'][values_ids]        # (B, T, E)
    hidden = (types_emb + values_emb).astype(jnp.float32)

    for blk in params['blocks']:
        # rel ids (B,T,T) -> embedding (B,T,T,H) -> (B,H,T,T) bf16 (use_tree=True).
        rel = jnp.transpose(blk['rel_w'][rel_ids], (0, 3, 1, 2))
        hidden = run_block(hidden, rel, blk, n_head=n_head, d_head=d_head)

    # Final LN + both weight-tied heads in one vocab-tiled pass.
    logits_all = run_lm_heads(hidden, params['lnf_w'], params['lnf_b'],
                              params['wte_head_all'])
    types_logits = logits_all[:, :, :Vt]
    values_logits = logits_all[:, :, Vt_p:Vt_p + Vv]
    return types_logits, values_logits


if __name__ == "__main__":
    # Small config: n_ctx = T = 8, n_embd = 32, n_head = 4, n_layer = 2
    B, T, E, H, L = 2, 8, 32, 4, 2
    Vt, Vv, Vr = 48, 64, 16

    key = jax.random.PRNGKey(0)
    kp, kt, kv, kr = jax.random.split(key, 4)
    params = init_params(kp, n_layer=L, n_embd=E, n_head=H,
                         types_vocab=Vt, values_vocab=Vv, rel_vocab=Vr)

    types_ids = jax.random.randint(kt, (B, T), 0, Vt)      # x['types']
    values_ids = jax.random.randint(kv, (B, T), 0, Vv)     # x['values']
    rel_ids = jax.random.randint(kr, (B, T, T), 0, Vr)     # rel

    types_logits, values_logits = transformer_forward(
        params, types_ids, values_ids, rel_ids, n_head=H)
    jax.block_until_ready((types_logits, values_logits))

    assert types_logits.shape == (B, T, Vt)
    assert values_logits.shape == (B, T, Vv)
    print("KERNEL_OK")
</pallas_src>

<mosaic_0001>
module attributes {stable_mosaic.version = 11 : i64} {
  func.func @block_kernel(%arg0: i32, %arg1: memref<1x8x32xf32, #tpu.memory_space<vmem>>, %arg2: memref<1x4x8x8xbf16, #tpu.memory_space<vmem>>, %arg3: memref<1x32xf32, #tpu.memory_space<vmem>>, %arg4: memref<1x32xf32, #tpu.memory_space<vmem>>, %arg5: memref<32x96xbf16, #tpu.memory_space<vmem>>, %arg6: memref<1x96xf32, #tpu.memory_space<vmem>>, %arg7: memref<32x32xbf16, #tpu.memory_space<vmem>>, %arg8: memref<1x32xf32, #tpu.memory_space<vmem>>, %arg9: memref<1x32xf32, #tpu.memory_space<vmem>>, %arg10: memref<1x32xf32, #tpu.memory_space<vmem>>, %arg11: memref<32x128xbf16, #tpu.memory_space<vmem>>, %arg12: memref<1x128xf32, #tpu.memory_space<vmem>>, %arg13: memref<128x32xbf16, #tpu.memory_space<vmem>>, %arg14: memref<1x32xf32, #tpu.memory_space<vmem>>, %arg15: memref<1x8x32xf32, #tpu.memory_space<vmem>>) attributes {dimension_semantics = [#tpu.dimension_semantics<parallel>], iteration_bounds = array<i64: 2>, scalar_prefetch = 0 : i64, scratch_operands = 0 : i64, tpu.core_type = #tpu.core_type<tc>, window_params = [{transform_indices = @transform_0, window_bounds = array<i64: 1, 8, 32>}, {transform_indices = @transform_1, window_bounds = array<i64: 1, 4, 8, 8>}, {pipeline_mode = #tpu.pipeline_mode<synchronous>, transform_indices = @transform_2, window_bounds = array<i64: 1, 32>}, {pipeline_mode = #tpu.pipeline_mode<synchronous>, transform_indices = @transform_3, window_bounds = array<i64: 1, 32>}, {pipeline_mode = #tpu.pipeline_mode<synchronous>, transform_indices = @transform_4, window_bounds = array<i64: 32, 96>}, {pipeline_mode = #tpu.pipeline_mode<synchronous>, transform_indices = @transform_5, window_bounds = array<i64: 1, 96>}, {pipeline_mode = #tpu.pipeline_mode<synchronous>, transform_indices = @transform_6, window_bounds = array<i64: 32, 32>}, {pipeline_mode = #tpu.pipeline_mode<synchronous>, transform_indices = @transform_7, window_bounds = array<i64: 1, 32>}, {pipeline_mode = #tpu.pipeline_mode<synchronous>, transform_indices = @transform_8, window_bounds = array<i64: 1, 32>}, {pipeline_mode = #tpu.pipeline_mode<synchronous>, transform_indices = @transform_9, window_bounds = array<i64: 1, 32>}, {pipeline_mode = #tpu.pipeline_mode<synchronous>, transform_indices = @transform_10, window_bounds = array<i64: 32, 128>}, {pipeline_mode = #tpu.pipeline_mode<synchronous>, transform_indices = @transform_11, window_bounds = array<i64: 1, 128>}, {pipeline_mode = #tpu.pipeline_mode<synchronous>, transform_indices = @transform_12, window_bounds = array<i64: 128, 32>}, {pipeline_mode = #tpu.pipeline_mode<synchronous>, transform_indices = @transform_13, window_bounds = array<i64: 1, 32>}, {transform_indices = @transform_14, window_bounds = array<i64: 1, 8, 32>}]} {
    %c0 = arith.constant 0 : index
    %c0_0 = arith.constant 0 : index
    %c0_1 = arith.constant 0 : index
    %0 = vector.load %arg1[%c0, %c0_0, %c0_1] : memref<1x8x32xf32, #tpu.memory_space<vmem>>, vector<1x8x32xf32>
    %1 = vector.shape_cast %0 : vector<1x8x32xf32> to vector<8x32xf32>
    %c0_2 = arith.constant 0 : index
    %c0_3 = arith.constant 0 : index
    %2 = vector.load %arg3[%c0_2, %c0_3] : memref<1x32xf32, #tpu.memory_space<vmem>>, vector<1x32xf32>
    %c0_4 = arith.constant 0 : index
    %c0_5 = arith.constant 0 : index
    %3 = vector.load %arg4[%c0_4, %c0_5] : memref<1x32xf32, #tpu.memory_space<vmem>>, vector<1x32xf32>
    %cst = arith.constant dense<0.000000e+00> : vector<8xf32>
    %4 = vector.multi_reduction <add>, %1, %cst [1] : vector<8x32xf32> to vector<8xf32>
    %5 = vector.shape_cast %4 : vector<8xf32> to vector<8x1xf32>
    %cst_6 = arith.constant 3.200000e+01 : f32
    %6 = vector.broadcast %cst_6 : f32 to vector<8x1xf32>
    %7 = arith.divf %5, %6 : vector<8x1xf32>
    %8 = vector.broadcast %7 : vector<8x1xf32> to vector<8x32xf32>
    %9 = arith.subf %1, %8 : vector<8x32xf32>
    %10 = arith.mulf %9, %9 : vector<8x32xf32>
    %cst_7 = arith.constant dense<0.000000e+00> : vector<8xf32>
    %11 = vector.multi_reduction <add>, %10, %cst_7 [1] : vector<8x32xf32> to vector<8xf32>
    %12 = vector.shape_cast %11 : vector<8xf32> to vector<8x1xf32>
    %cst_8 = arith.constant 3.100000e+01 : f32
    %13 = vector.broadcast %cst_8 : f32 to vector<8x1xf32>
    %14 = arith.divf %12, %13 : vector<8x1xf32>
    %15 = math.sqrt %14 : vector<8x1xf32>
    %cst_9 = arith.constant 9.99999997E-7 : f32
    %16 = vector.broadcast %cst_9 : f32 to vector<8x1xf32>
    %17 = arith.addf %15, %16 : vector<8x1xf32>
    %18 = vector.broadcast %17 : vector<8x1xf32> to vector<8x32xf32>
    %19 = arith.divf %9, %18 : vector<8x32xf32>
    %20 = vector.broadcast %2 : vector<1x32xf32> to vector<8x32xf32>
    %21 = arith.mulf %20, %19 : vector<8x32xf32>
    %22 = vector.broadcast %3 : vector<1x32xf32> to vector<8x32xf32>
    %23 = arith.addf %21, %22 : vector<8x32xf32>
    %24 = arith.truncf %23 : vector<8x32xf32> to vector<8x32xbf16>
    %c0_10 = arith.constant 0 : index
    %c0_11 = arith.constant 0 : index
    %25 = vector.load %arg5[%c0_10, %c0_11] : memref<32x96xbf16, #tpu.memory_space<vmem>>, vector<32x96xbf16>
    %cst_12 = arith.constant dense<0.000000e+00> : vector<8x96xf32>
    %26 = tpu.matmul %24, %25, %cst_12 {dimension_numbers = #tpu.dot_dimension_numbers<[1], [0], [0], [1], [0, 0, 1, 1], [], []>} : vector<8x32xbf16>, vector<32x96xbf16>, vector<8x96xf32> -> vector<8x96xf32>
    %c0_13 = arith.constant 0 : index
    %c0_14 = arith.constant 0 : index
    %27 = vector.load %arg6[%c0_13, %c0_14] : memref<1x96xf32, #tpu.memory_space<vmem>>, vector<1x96xf32>
    %28 = vector.broadcast %27 : vector<1x96xf32> to vector<8x96xf32>
    %29 = arith.addf %26, %28 : vector<8x96xf32>
    %30 = arith.truncf %29 : vector<8x96xf32> to vector<8x96xbf16>
    %31 = vector.extract_strided_slice %30 {offsets = [0, 0], sizes = [8, 8], strides = [1, 1]} : vector<8x96xbf16> to vector<8x8xbf16>
    %32 = vector.extract_strided_slice %30 {offsets = [0, 8], sizes = [8, 8], strides = [1, 1]} : vector<8x96xbf16> to vector<8x8xbf16>
    %33 = vector.extract_strided_slice %30 {offsets = [0, 16], sizes = [8, 8], strides = [1, 1]} : vector<8x96xbf16> to vector<8x8xbf16>
    %34 = vector.extract_strided_slice %30 {offsets = [0, 24], sizes = [8, 8], strides = [1, 1]} : vector<8x96xbf16> to vector<8x8xbf16>
    %35 = vector.shape_cast %31 : vector<8x8xbf16> to vector<1x8x8xbf16>
    %36 = vector.shape_cast %32 : vector<8x8xbf16> to vector<1x8x8xbf16>
    %37 = vector.shape_cast %33 : vector<8x8xbf16> to vector<1x8x8xbf16>
    %38 = vector.shape_cast %34 : vector<8x8xbf16> to vector<1x8x8xbf16>
    %39 = tpu.concatenate %35, %36, %37, %38 in 0 : vector<1x8x8xbf16>, vector<1x8x8xbf16>, vector<1x8x8xbf16>, vector<1x8x8xbf16> -> vector<4x8x8xbf16>
    %40 = vector.extract_strided_slice %30 {offsets = [0, 32], sizes = [8, 8], strides = [1, 1]} : vector<8x96xbf16> to vector<8x8xbf16>
    %41 = vector.extract_strided_slice %30 {offsets = [0, 40], sizes = [8, 8], strides = [1, 1]} : vector<8x96xbf16> to vector<8x8xbf16>
    %42 = vector.extract_strided_slice %30 {offsets = [0, 48], sizes = [8, 8], strides = [1, 1]} : vector<8x96xbf16> to vector<8x8xbf16>
    %43 = vector.extract_strided_slice %30 {offsets = [0, 56], sizes = [8, 8], strides = [1, 1]} : vector<8x96xbf16> to vector<8x8xbf16>
    %44 = vector.shape_cast %40 : vector<8x8xbf16> to vector<1x8x8xbf16>
    %45 = vector.shape_cast %41 : vector<8x8xbf16> to vector<1x8x8xbf16>
    %46 = vector.shape_cast %42 : vector<8x8xbf16> to vector<1x8x8xbf16>
    %47 = vector.shape_cast %43 : vector<8x8xbf16> to vector<1x8x8xbf16>
    %48 = tpu.concatenate %44, %45, %46, %47 in 0 : vector<1x8x8xbf16>, vector<1x8x8xbf16>, vector<1x8x8xbf16>, vector<1x8x8xbf16> -> vector<4x8x8xbf16>
    %49 = vector.extract_strided_slice %30 {offsets = [0, 64], sizes = [8, 8], strides = [1, 1]} : vector<8x96xbf16> to vector<8x8xbf16>
    %50 = vector.extract_strided_slice %30 {offsets = [0, 72], sizes = [8, 8], strides = [1, 1]} : vector<8x96xbf16> to vector<8x8xbf16>
    %51 = vector.extract_strided_slice %30 {offsets = [0, 80], sizes = [8, 8], strides = [1, 1]} : vector<8x96xbf16> to vector<8x8xbf16>
    %52 = vector.extract_strided_slice %30 {offsets = [0, 88], sizes = [8, 8], strides = [1, 1]} : vector<8x96xbf16> to vector<8x8xbf16>
    %53 = vector.shape_cast %49 : vector<8x8xbf16> to vector<1x8x8xbf16>
    %54 = vector.shape_cast %50 : vector<8x8xbf16> to vector<1x8x8xbf16>
    %55 = vector.shape_cast %51 : vector<8x8xbf16> to vector<1x8x8xbf16>
    %56 = vector.shape_cast %52 : vector<8x8xbf16> to vector<1x8x8xbf16>
    %57 = tpu.concatenate %53, %54, %55, %56 in 0 : vector<1x8x8xbf16>, vector<1x8x8xbf16>, vector<1x8x8xbf16>, vector<1x8x8xbf16> -> vector<4x8x8xbf16>
    "tpu.trace_start"() <{level = 10 : i32, message = "hqd,hkd->hqk"}> : () -> ()
    %cst_15 = arith.constant dense<0.000000e+00> : vector<4x8x8xf32>
    %58 = tpu.matmul %39, %48, %cst_15 {dimension_numbers = #tpu.dot_dimension_numbers<[2], [2], [1], [1], [0, 0, 0, 1, 1, 1], [0], [0]>} : vector<4x8x8xbf16>, vector<4x8x8xbf16>, vector<4x8x8xf32> -> vector<4x8x8xf32>
    "tpu.trace_stop"() : () -> ()
    %c0_16 = arith.constant 0 : index
    %c0_17 = arith.constant 0 : index
    %c0_18 = arith.constant 0 : index
    %c0_19 = arith.constant 0 : index
    %59 = vector.load %arg2[%c0_16, %c0_17, %c0_18, %c0_19] : memref<1x4x8x8xbf16, #tpu.memory_space<vmem>>, vector<1x4x8x8xbf16>
    %60 = vector.shape_cast %59 : vector<1x4x8x8xbf16> to vector<4x8x8xbf16>
    %61 = arith.extf %60 : vector<4x8x8xbf16> to vector<4x8x8xf32>
    %62 = tpu.iota {dimensions = array<i32: 0>} : vector<8x8xi32>
    %63 = tpu.iota {dimensions = array<i32: 1>} : vector<8x8xi32>
    %64 = arith.cmpi sge, %62, %63 : vector<8x8xi32>
    %65 = vector.shape_cast %64 : vector<8x8xi1> to vector<1x8x8xi1>
    %cst_20 = arith.constant 0.353553385 : f32
    %66 = vector.broadcast %cst_20 : f32 to vector<4x8x8xf32>
    %67 = arith.mulf %58, %66 : vector<4x8x8xf32>
    %68 = arith.addf %67, %61 : vector<4x8x8xf32>
    %cst_21 = arith.constant -1.000000e+10 : f32
    %69 = vector.shape_cast %65 : vector<1x8x8xi1> to vector<1x8x8xi1>
    %70 = vector.broadcast %69 : vector<1x8x8xi1> to vector<4x8x8xi1>
    %71 = vector.broadcast %cst_21 : f32 to vector<4x8x8xf32>
    %72 = arith.select %70, %68, %71 : vector<4x8x8xi1>, vector<4x8x8xf32>
    %cst_22 = arith.constant dense<0xFF800000> : vector<4x8xf32>
    %73 = vector.multi_reduction <maximumf>, %72, %cst_22 [2] : vector<4x8x8xf32> to vector<4x8xf32>
    %74 = vector.shape_cast %73 : vector<4x8xf32> to vector<4x8x1xf32>
    %75 = vector.broadcast %74 : vector<4x8x1xf32> to vector<4x8x8xf32>
    %76 = arith.subf %72, %75 : vector<4x8x8xf32>
    %77 = math.exp %76 : vector<4x8x8xf32>
    %cst_23 = arith.constant dense<0.000000e+00> : vector<4x8xf32>
    %78 = vector.multi_reduction <add>, %77, %cst_23 [2] : vector<4x8x8xf32> to vector<4x8xf32>
    %79 = vector.shape_cast %78 : vector<4x8xf32> to vector<4x8x1xf32>
    %80 = tpu.reciprocal %79 {approx = true} : vector<4x8x1xf32> -> vector<4x8x1xf32>
    %81 = vector.broadcast %80 : vector<4x8x1xf32> to vector<4x8x8xf32>
    %82 = arith.mulf %77, %81 : vector<4x8x8xf32>
    %83 = arith.truncf %82 : vector<4x8x8xf32> to vector<4x8x8xbf16>
    "tpu.trace_start"() <{level = 10 : i32, message = "hqk,hkd->hqd"}> : () -> ()
    %cst_24 = arith.constant dense<0.000000e+00> : vector<4x8x8xf32>
    %84 = tpu.matmul %83, %57, %cst_24 {dimension_numbers = #tpu.dot_dimension_numbers<[2], [1], [1], [2], [0, 0, 0, 1, 1, 2], [0], [0]>} : vector<4x8x8xbf16>, vector<4x8x8xbf16>, vector<4x8x8xf32> -> vector<4x8x8xf32>
    "tpu.trace_stop"() : () -> ()
    %85 = vector.extract_strided_slice %84 {offsets = [0, 0, 0], sizes = [1, 8, 8], strides = [1, 1, 1]} : vector<4x8x8xf32> to vector<1x8x8xf32>
    %86 = vector.shape_cast %85 : vector<1x8x8xf32> to vector<8x8xf32>
    %87 = vector.extract_strided_slice %84 {offsets = [1, 0, 0], sizes = [1, 8, 8], strides = [1, 1, 1]} : vector<4x8x8xf32> to vector<1x8x8xf32>
    %88 = vector.shape_cast %87 : vector<1x8x8xf32> to vector<8x8xf32>
    %89 = vector.extract_strided_slice %84 {offsets = [2, 0, 0], sizes = [1, 8, 8], strides = [1, 1, 1]} : vector<4x8x8xf32> to vector<1x8x8xf32>
    %90 = vector.shape_cast %89 : vector<1x8x8xf32> to vector<8x8xf32>
    %91 = vector.extract_strided_slice %84 {offsets = [3, 0, 0], sizes = [1, 8, 8], strides = [1, 1, 1]} : vector<4x8x8xf32> to vector<1x8x8xf32>
    %92 = vector.shape_cast %91 : vector<1x8x8xf32> to vector<8x8xf32>
    %93 = tpu.concatenate %86, %88, %90, %92 in 1 : vector<8x8xf32>, vector<8x8xf32>, vector<8x8xf32>, vector<8x8xf32> -> vector<8x32xf32>
    %94 = arith.truncf %93 : vector<8x32xf32> to vector<8x32xbf16>
    %c0_25 = arith.constant 0 : index
    %c0_26 = arith.constant 0 : index
    %95 = vector.load %arg7[%c0_25, %c0_26] : memref<32x32xbf16, #tpu.memory_space<vmem>>, vector<32x32xbf16>
    %cst_27 = arith.constant dense<0.000000e+00> : vector<8x32xf32>
    %96 = tpu.matmul %94, %95, %cst_27 {dimension_numbers = #tpu.dot_dimension_numbers<[1], [0], [0], [1], [0, 0, 1, 1], [], []>} : vector<8x32xbf16>, vector<32x32xbf16>, vector<8x32xf32> -> vector<8x32xf32>
    %c0_28 = arith.constant 0 : index
    %c0_29 = arith.constant 0 : index
    %97 = vector.load %arg8[%c0_28, %c0_29] : memref<1x32xf32, #tpu.memory_space<vmem>>, vector<1x32xf32>
    %98 = vector.broadcast %97 : vector<1x32xf32> to vector<8x32xf32>
    %99 = arith.addf %96, %98 : vector<8x32xf32>
    %100 = arith.addf %1, %99 : vector<8x32xf32>
    %c0_30 = arith.constant 0 : index
    %c0_31 = arith.constant 0 : index
    %101 = vector.load %arg9[%c0_30, %c0_31] : memref<1x32xf32, #tpu.memory_space<vmem>>, vector<1x32xf32>
    %c0_32 = arith.constant 0 : index
    %c0_33 = arith.constant 0 : index
    %102 = vector.load %arg10[%c0_32, %c0_33] : memref<1x32xf32, #tpu.memory_space<vmem>>, vector<1x32xf32>
    %cst_34 = arith.constant dense<0.000000e+00> : vector<8xf32>
    %103 = vector.multi_reduction <add>, %100, %cst_34 [1] : vector<8x32xf32> to vector<8xf32>
    %104 = vector.shape_cast %103 : vector<8xf32> to vector<8x1xf32>
    %cst_35 = arith.constant 3.200000e+01 : f32
    %105 = vector.broadcast %cst_35 : f32 to vector<8x1xf32>
    %106 = arith.divf %104, %105 : vector<8x1xf32>
    %107 = vector.broadcast %106 : vector<8x1xf32> to vector<8x32xf32>
    %108 = arith.subf %100, %107 : vector<8x32xf32>
    %109 = arith.mulf %108, %108 : vector<8x32xf32>
    %cst_36 = arith.constant dense<0.000000e+00> : vector<8xf32>
    %110 = vector.multi_reduction <add>, %109, %cst_36 [1] : vector<8x32xf32> to vector<8xf32>
    %111 = vector.shape_cast %110 : vector<8xf32> to vector<8x1xf32>
    %cst_37 = arith.constant 3.100000e+01 : f32
    %112 = vector.broadcast %cst_37 : f32 to vector<8x1xf32>
    %113 = arith.divf %111, %112 : vector<8x1xf32>
    %114 = math.sqrt %113 : vector<8x1xf32>
    %cst_38 = arith.constant 9.99999997E-7 : f32
    %115 = vector.broadcast %cst_38 : f32 to vector<8x1xf32>
    %116 = arith.addf %114, %115 : vector<8x1xf32>
    %117 = vector.broadcast %116 : vector<8x1xf32> to vector<8x32xf32>
    %118 = arith.divf %108, %117 : vector<8x32xf32>
    %119 = vector.broadcast %101 : vector<1x32xf32> to vector<8x32xf32>
    %120 = arith.mulf %119, %118 : vector<8x32xf32>
    %121 = vector.broadcast %102 : vector<1x32xf32> to vector<8x32xf32>
    %122 = arith.addf %120, %121 : vector<8x32xf32>
    %123 = arith.truncf %122 : vector<8x32xf32> to vector<8x32xbf16>
    %c0_39 = arith.constant 0 : index
    %c0_40 = arith.constant 0 : index
    %124 = vector.load %arg11[%c0_39, %c0_40] : memref<32x128xbf16, #tpu.memory_space<vmem>>, vector<32x128xbf16>
    %cst_41 = arith.constant dense<0.000000e+00> : vector<8x128xf32>
    %125 = tpu.matmul %123, %124, %cst_41 {dimension_numbers = #tpu.dot_dimension_numbers<[1], [0], [0], [1], [0, 0, 1, 1], [], []>} : vector<8x32xbf16>, vector<32x128xbf16>, vector<8x128xf32> -> vector<8x128xf32>
    %c0_42 = arith.constant 0 : index
    %c0_43 = arith.constant 0 : index
    %126 = vector.load %arg12[%c0_42, %c0_43] : memref<1x128xf32, #tpu.memory_space<vmem>>, vector<1x128xf32>
    %127 = vector.broadcast %126 : vector<1x128xf32> to vector<8x128xf32>
    %128 = arith.addf %125, %127 : vector<8x128xf32>
    %cst_44 = arith.constant 5.000000e-01 : f32
    %129 = vector.broadcast %cst_44 : f32 to vector<8x128xf32>
    %130 = arith.mulf %129, %128 : vector<8x128xf32>
    %cst_45 = arith.constant 4.471500e-02 : f32
    %131 = vector.broadcast %cst_45 : f32 to vector<8x128xf32>
    %132 = arith.mulf %131, %128 : vector<8x128xf32>
    %133 = arith.mulf %132, %128 : vector<8x128xf32>
    %134 = arith.mulf %133, %128 : vector<8x128xf32>
    %135 = arith.addf %128, %134 : vector<8x128xf32>
    %cst_46 = arith.constant 0.797884583 : f32
    %136 = vector.broadcast %cst_46 : f32 to vector<8x128xf32>
    %137 = arith.mulf %136, %135 : vector<8x128xf32>
    %138 = math.tanh %137 : vector<8x128xf32>
    %cst_47 = arith.constant 1.000000e+00 : f32
    %139 = vector.broadcast %cst_47 : f32 to vector<8x128xf32>
    %140 = arith.addf %139, %138 : vector<8x128xf32>
    %141 = arith.mulf %130, %140 : vector<8x128xf32>
    %142 = arith.truncf %141 : vector<8x128xf32> to vector<8x128xbf16>
    %c0_48 = arith.constant 0 : index
    %c0_49 = arith.constant 0 : index
    %143 = vector.load %arg13[%c0_48, %c0_49] : memref<128x32xbf16, #tpu.memory_space<vmem>>, vector<128x32xbf16>
    %cst_50 = arith.constant dense<0.000000e+00> : vector<8x32xf32>
    %144 = tpu.matmul %142, %143, %cst_50 {dimension_numbers = #tpu.dot_dimension_numbers<[1], [0], [0], [1], [0, 0, 1, 1], [], []>} : vector<8x128xbf16>, vector<128x32xbf16>, vector<8x32xf32> -> vector<8x32xf32>
    %c0_51 = arith.constant 0 : index
    %c0_52 = arith.constant 0 : index
    %145 = vector.load %arg14[%c0_51, %c0_52] : memref<1x32xf32, #tpu.memory_space<vmem>>, vector<1x32xf32>
    %146 = vector.broadcast %145 : vector<1x32xf32> to vector<8x32xf32>
    %147 = arith.addf %144, %146 : vector<8x32xf32>
    %148 = arith.addf %100, %147 : vector<8x32xf32>
    %c0_53 = arith.constant 0 : index
    %c0_54 = arith.constant 0 : index
    %c0_55 = arith.constant 0 : index
    %149 = vector.load %arg15[%c0_53, %c0_54, %c0_55] : memref<1x8x32xf32, #tpu.memory_space<vmem>>, vector<1x8x32xf32>
    %150 = vector.shape_cast %149 : vector<1x8x32xf32> to vector<8x32xf32>
    %151 = vector.shape_cast %148 : vector<8x32xf32> to vector<1x8x32xf32>
    tpu.vector_store %arg15[%c0_53, %c0_54, %c0_55], %151 {strides = array<i32>} : memref<1x8x32xf32, #tpu.memory_space<vmem>>, vector<1x8x32xf32>,
    return
  }
  func.func @transform_0(%arg0: i32) -> (i32, i32, i32) {
    %c0_i32 = arith.constant 0 : i32
    %c0_i32_0 = arith.constant 0 : i32
    %c0_i32_1 = arith.constant 0 : i32
    return %arg0, %c0_i32, %c0_i32_0 : i32, i32, i32
  }
  func.func @transform_1(%arg0: i32) -> (i32, i32, i32, i32) {
    %c0_i32 = arith.constant 0 : i32
    %c0_i32_0 = arith.constant 0 : i32
    %c0_i32_1 = arith.constant 0 : i32
    %c0_i32_2 = arith.constant 0 : i32
    return %arg0, %c0_i32, %c0_i32_0, %c0_i32_1 : i32, i32, i32, i32
  }
  func.func @transform_2(%arg0: i32) -> (i32, i32) {
    %c0_i32 = arith.constant 0 : i32
    %c0_i32_0 = arith.constant 0 : i32
    %c0_i32_1 = arith.constant 0 : i32
    return %c0_i32, %c0_i32_0 : i32, i32
  }
  func.func @transform_3(%arg0: i32) -> (i32, i32) {
    %c0_i32 = arith.constant 0 : i32
    %c0_i32_0 = arith.constant 0 : i32
    %c0_i32_1 = arith.constant 0 : i32
    return %c0_i32, %c0_i32_0 : i32, i32
  }
  func.func @transform_4(%arg0: i32) -> (i32, i32) {
    %c0_i32 = arith.constant 0 : i32
    %c0_i32_0 = arith.constant 0 : i32
    %c0_i32_1 = arith.constant 0 : i32
    return %c0_i32, %c0_i32_0 : i32, i32
  }
  func.func @transform_5(%arg0: i32) -> (i32, i32) {
    %c0_i32 = arith.constant 0 : i32
    %c0_i32_0 = arith.constant 0 : i32
    %c0_i32_1 = arith.constant 0 : i32
    return %c0_i32, %c0_i32_0 : i32, i32
  }
  func.func @transform_6(%arg0: i32) -> (i32, i32) {
    %c0_i32 = arith.constant 0 : i32
    %c0_i32_0 = arith.constant 0 : i32
    %c0_i32_1 = arith.constant 0 : i32
    return %c0_i32, %c0_i32_0 : i32, i32
  }
  func.func @transform_7(%arg0: i32) -> (i32, i32) {
    %c0_i32 = arith.constant 0 : i32
    %c0_i32_0 = arith.constant 0 : i32
    %c0_i32_1 = arith.constant 0 : i32
    return %c0_i32, %c0_i32_0 : i32, i32
  }
  func.func @transform_8(%arg0: i32) -> (i32, i32) {
    %c0_i32 = arith.constant 0 : i32
    %c0_i32_0 = arith.constant 0 : i32
    %c0_i32_1 = arith.constant 0 : i32
    return %c0_i32, %c0_i32_0 : i32, i32
  }
  func.func @transform_9(%arg0: i32) -> (i32, i32) {
    %c0_i32 = arith.constant 0 : i32
    %c0_i32_0 = arith.constant 0 : i32
    %c0_i32_1 = arith.constant 0 : i32
    return %c0_i32, %c0_i32_0 : i32, i32
  }
  func.func @transform_10(%arg0: i32) -> (i32, i32) {
    %c0_i32 = arith.constant 0 : i32
    %c0_i32_0 = arith.constant 0 : i32
    %c0_i32_1 = arith.constant 0 : i32
    return %c0_i32, %c0_i32_0 : i32, i32
  }
  func.func @transform_11(%arg0: i32) -> (i32, i32) {
    %c0_i32 = arith.constant 0 : i32
    %c0_i32_0 = arith.constant 0 : i32
    %c0_i32_1 = arith.constant 0 : i32
    return %c0_i32, %c0_i32_0 : i32, i32
  }
  func.func @transform_12(%arg0: i32) -> (i32, i32) {
    %c0_i32 = arith.constant 0 : i32
    %c0_i32_0 = arith.constant 0 : i32
    %c0_i32_1 = arith.constant 0 : i32
    return %c0_i32, %c0_i32_0 : i32, i32
  }
  func.func @transform_13(%arg0: i32) -> (i32, i32) {
    %c0_i32 = arith.constant 0 : i32
    %c0_i32_0 = arith.constant 0 : i32
    %c0_i32_1 = arith.constant 0 : i32
    return %c0_i32, %c0_i32_0 : i32, i32
  }
  func.func @transform_14(%arg0: i32) -> (i32, i32, i32) {
    %c0_i32 = arith.constant 0 : i32
    %c0_i32_0 = arith.constant 0 : i32
    %c0_i32_1 = arith.constant 0 : i32
    return %arg0, %c0_i32, %c0_i32_0 : i32, i32, i32
  }
}

</mosaic_0001>

<bundles_post_ra>
// kernel: tpu_custom_call.1
= control target key start
LH: loop header
LB: loop body
LE: loop exit
PB: predicated region body
PF: predicated region fallthrough
CT: control target
= control target key end

     0   :  { %s1819_s0 = inlined_call_operand.vmem [shape: f32[2,8,32], index: 0, kind: input, shape index: {}]   ;;  %s1820_s1 = inlined_call_operand.vmem [shape: bf16[2,4,8,8], index: 1, kind: input, shape index: {}]   ;;  %s1821_s2 = inlined_call_operand.vmem [shape: f32[1,32], index: 2, kind: input, shape index: {}]   ;;  %s1822_s3 = inlined_call_operand.vmem [shape: f32[1,32], index: 3, kind: input, shape index: {}]   ;;  %s1823_s4 = inlined_call_operand.vmem [shape: bf16[32,96], index: 4, kind: input, shape index: {}]   ;;  %s1824_s5 = inlined_call_operand.vmem [shape: f32[1,96], index: 5, kind: input, shape index: {}]   ;;  %s1825_s6 = inlined_call_operand.vmem [shape: bf16[32,32], index: 6, kind: input, shape index: {}]   ;;  %s1826_s7 = inlined_call_operand.vmem [shape: f32[1,32], index: 7, kind: input, shape index: {}]   ;;  %s1827_s8 = inlined_call_operand.vmem [shape: f32[1,32], index: 8, kind: input, shape index: {}]   ;;  %s1828_s9 = inlined_call_operand.vmem [shape: f32[1,32], index: 9, kind: input, shape index: {}]   ;;  %s1829_s10 = inlined_call_operand.hbm [shape: bf16[32,128], index: 10, kind: input, shape index: {}]   ;;  %s1830_s11 = inlined_call_operand.vmem [shape: f32[1,128], index: 11, kind: input, shape index: {}]   ;;  %s1831_s12 = inlined_call_operand.vmem [shape: bf16[128,32], index: 12, kind: input, shape index: {}]   ;;  %s1832_s13 = inlined_call_operand.vmem [shape: f32[1,32], index: 13, kind: input, shape index: {}]   ;;  %s1833_s14 = inlined_call_operand.hbm [shape: f32[2,8,32], index: 14, kind: output, shape index: {}]  }
   0x1   :  { %1834 = sst [smem:[#allocation9_spill]] %s1819_s0 }
   0x2   :  { %1835 = sst [smem:[#allocation10_spill]] %s1820_s1 }
   0x3   :  { %1836 = sst [smem:[#allocation11_spill]] %s1821_s2 }
   0x4   :  { %1837 = sst [smem:[#allocation12_spill]] %s1829_s10 }
   0x5   :  { %19 = vsyncpa [#allocation3], 0 }
   0x6   :  { %20 = vsyncpa [#allocation4], 0 }
   0x7   :  { %22 = vsyncpa [#allocation4 + $0x1], 0  ;;  %s1586_s29 = smov 0   ;;  %s1588_s30 = smov 0  }
   0x8   :  { %s1590_s15 = smov 0   ;;  %s1592_s16 = smov 0  }
   0x9 LB: > { %s1607_s17 = sadd.s32 4294967295, %s1496_s16   ;;  %s1195_s18 = sadd.s32 4294967294, %s1496_s16   ;;  %s1496_s16 = sphi %s1592_s16, %s1849_s16   ;;  %s1492_s15 = sphi %s1590_s15, %s1848_s15   ;;  %s1488_s30 = sphi %s1588_s30, %s1847_s30   ;;  %s1484_s29 = sphi %s1586_s29, %s1846_s29  }
   0xa   : > { %s1611_s19 = sadd.s32 1, %s1496_s16   ;;  %s339_s20 = sadd.s32 1, %s1492_s15 }
   0xb   : > { %s336_s21 = ssub.s32 %s1496_s16, %s1611_s19  ;;  %p349_p0 = scmp.ne.s32.totalorder %s1492_s15, %s1488_s30 }
   0xc   : > { %p337_p1 = scmp.eq.s32.totalorder %s336_s21, 0  ;;  %p350_p2 = scmp.eq.s32.totalorder %s1607_s17, 1 }
   0xd   : > { %p355_p3 = scmp.ne.s32.totalorder %s1488_s30, %s1484_s29  ;;  %p356_p4 = scmp.eq.s32.totalorder %s1195_s18, 1 }
   0xe   : > { %s1622_s22 = scalar_select %p337_p1, %s1492_s15, %s339_s20  }
   0xf   : > { %p1624_p5 = por %p350_p2, %p349_p0  ;;  %p1628_p6 = por %p356_p4, %p355_p3 }
  0x10   : > { %1838 = sst [smem:[#allocation8_spill]] %s1622_s22  ;;  %p1196_p7 = scmp.ge.s32.totalorder %s1496_s16, 1 }
  0x11   : > { %p363_p8 = scmp.lt.s32.totalorder %s1496_s16, 3  ;;  %p1314_p9 = scmp.eq.s32.totalorder %s1607_s17, 0 }
  0x12   : > { %s1841_s10 = sld [smem:[#allocation12_spill]]  ;;  %s1498_s28 = smov [#allocation2]  }
  0x13   : > { %p364_p10 = pnand %p1196_p7, %p363_p8  ;;  %s400_s18 = sshll.u32 %s1498_s28, 4  ;;  %s401_s18 = int_to_ptr.vmem [resolvable:$true] %s400_s18 }
  0x14   : > { %s1499_s20 = smov 64   ;;  %s1500_s21 = smov 4  }
  0x15   : > { %p1306_p11 = pneg %p364_p10  ;;  %440 = sbr.rel (%p364_p10) target bundleno = 2046 (0x7fe), region = 76 }
  0x17   : > { %p1307_p12 = pnand %p1314_p9, %p1306_p11 }
  0x18   : > { %s398_s27 = sshll.u32 %s1841_s10, 4  ;;  %s399_s27 = int_to_ptr.hbm [resolvable:$true] %s398_s27 }
  0x19   : > { %1309 = dma.hbm_to_vmem [thread:$0]  (!%p1307_p12), %s399_s27, 256, %s401_s18, [#allocation3], %s1499_s20, %s1499_s20, %s1500_s21  }
  0x1a   : > { %1475 = dma.done.wait (%p1314_p9), [#allocation3], 256  }
  0x1b   : > { %1477 = vsyncadd (%p1314_p9), [#allocation3], 4294967040  ;;  %p491_p13 = scmp.lt.s32.totalorder %s1607_s17, 1  ;;  %s1842_s0 = sld [smem:[#allocation9_spill]]  ;;  %vm504_vm0 = vcmask 261120   ;;  %v1501_v2 = vmov 32.0  }
  0x1c   : > { %1370 = vrcp.f32 %v1501_v2  ;;  %v1502_v14 = vmov 31.0   ;;  %v1278_v19 = vld [vmem:[%s1823_s4 + $0x8] sm:$0xff]  ;;  %v1277_v20 = vld [vmem:[%s1823_s4] sm:$0xff]  ;;  %s1843_s2 = sld [smem:[#allocation11_spill]]  ;;  %s1503_s27 = smov 104   ;;  %vm614_vm9 = vcmask 64512  }
  0x1d   : > { %s1646_s25 = scalar_select %p491_p13, %s1607_s17, 1  ;;  %1372 = vrcp.f32 %v1502_v14  ;;  %595 = vmatpush.bf16.msra.mxu0 %v1278_v19  ;;  %v1363_v48 = vld [vmem:[%s1822_s3] ss:$0 sm:$0xff]  ;;  %v711_v14 = vlaneseq  ;;  %vm783_vm11 = vcmask 1043456   ;;  %vm876_vm12 = vcmask 130048  }
  0x1e   : > { %v1364_v52 = vld [vmem:[%s1824_s5] ss:$0 sm:$0xff]  ;;  %s1504_s18 = smov 120   ;;  %s1505_s20 = smov 112   ;;  %vm878_vm13 = vcmask 195584  }
  0x1f   : > { %s1202_s26 = sshll.u32 %s1646_s25, 3  ;;  %s1506_s21 = smov 96  }
  0x20   : > { %s1844_s1 = sld [smem:[#allocation10_spill]] }
  0x21   : > { %s494_s22 = scalar_lea.vmem %s1842_s0, %s1202_s26  ;;  %596 = vmatpush.bf16.msra.mxu0 %v1277_v20  ;;  %s1276_s26 = sshll.u32 %s1646_s25, 4 }
  0x22   : > { %v1652_v0 = vld [vmem:[%s494_s22] sm:$0xff]  ;;  %v1371_v3 = vpop.eup %1370  ;;  %s1507_s25 = smov 64   ;;  %s488_s0 = sand.u32 1, %s1488_s30  }
  0x23   : > { %v505_v1 = vsel %vm504_vm0, %v1652_v0, 0.0  ;;  %v509_v4 = vmul.f32 32.0, %v1371_v3  ;;  %vm513_vm1 = vweird.f32 %v1371_v3  ;;  %v1373_v15 = vpop.eup %1372  ;;  %v1362_v45 = vld [vmem:[%s1843_s2] ss:$0 sm:$0xff] }
  0x24   : > { %506 = vadd.xlane.f32.xlu0 %v505_v1  ;;  %v522_v16 = vmul.f32 31.0, %v1373_v15  ;;  %vm526_vm2 = vweird.f32 %v1373_v15 }
  0x25   : > { %v510_v5 = vsub.f32 1.0, %v509_v4 }
  0x26   : > { %v523_v17 = vsub.f32 1.0, %v522_v16  ;;  %s499_s22 = scalar_lea.vmem %s1844_s1, %s1276_s26  ;;  %v712_v16 = vshrl.u32 %v711_v14, 7  ;;  %s1273_s26 = sshll.u32 %s1607_s17, 3 }
  0x27   : > { %v511_v6 = vmul.f32 %v1371_v3, %v510_v5  ;;  %s1097_s17 = scalar_lea.sflag [#allocation4], %s488_s0 }
  0x28   : > { %v524_v18 = vmul.f32 %v1373_v15, %v523_v17  ;;  %v714_v17 = vand.u32 127, %v711_v14 }
  0x29   : > { %v512_v7 = vadd.f32 %v1371_v3, %v511_v6 }
  0x2a   : > { %v525_v21 = vadd.f32 %v1373_v15, %v524_v18  ;;  %vm715_vm10 = vcmp.ge.s32.totalorder %v712_v16, %v714_v17 }
  0x2b   : > { %v1656_v8 = vsel %vm513_vm1, %v1371_v3, %v512_v7 }
  0x2c   : > { %v1667_v22 = vsel %vm526_vm2, %v1373_v15, %v525_v21  ;;  %v1299_v15 = vld [vmem:[%s499_s22 + $0x8] sm:$0xff]   ;;  %v1292_v21 = vld [vmem:[%s499_s22] sm:$0xff]  }
  0x2d   : > { %v1298_v18 = vunpack.c.h.bf16 %v1299_v15 }
  0x97   : > { %v507_v9 = vpop.xlane.xlu0 %506 }
  0x98   : > { %v515_v10 = vmul.f32 %v1656_v8, %v507_v9 }
  0x9a   : > { %v516_v11 = vsub.f32 %v1652_v0, %v515_v10 }
  0x9c   : > { %v517_v12 = vmul.f32 %v516_v11, %v516_v11 }
  0x9e   : > { %v518_v13 = vsel %vm504_vm0, %v517_v12, 0.0 }
  0x9f   : > { %519 = vadd.xlane.f32.xlu0 %v518_v13 }
 0x112   : > { %v520_v23 = vpop.xlane.xlu0 %519 }
 0x113   : > { %v528_v24 = vmul.f32 %v1667_v22, %v520_v23 }
 0x115   : > { %1374 = vrsqrt.f32 %v528_v24  ;;  %vm536_vm3 = vcmp.eq.f32.partialorder %v528_v24, inf  ;;  %v539_v32 = vand.u32 2147483648, %v528_v24  ;;  %vm538_vm4 = vcmp.eq.f32.partialorder %v528_v24, 0.0 }
 0x11b   : > { %v1375_v25 = vpop.eup %1374 }
 0x11c   : > { %v530_v26 = vmul.f32 %v1375_v25, %v528_v24 }
 0x11e   : > { %v531_v27 = vmul.f32 %v1375_v25, %v530_v26 }
 0x120   : > { %v532_v28 = vmul.f32 0.5, %v531_v27 }
 0x122   : > { %v533_v29 = vsub.f32 1.5, %v532_v28 }
 0x124   : > { %v534_v30 = vmul.f32 %v1375_v25, %v533_v29 }
 0x126   : > { %v535_v31 = vmul.f32 %v534_v30, %v528_v24 }
 0x128   : > { %v537_v33 = vsel %vm536_vm3, %v528_v24, %v535_v31  ;;  %v1294_v24 = vunpack.c.h.bf16 %v1292_v21 }
 0x129   : > { %v540_v34 = vsel %vm538_vm4, %v539_v32, %v537_v33 }
 0x12a   : > { %v541_v35 = vadd.f32 1e-06, %v540_v34 }
 0x12c   : > { %1376 = vrcp.f32 %v541_v35  ;;  %v553_v39 = vand.u32 2147483648, %v541_v35  ;;  %v551_v41 = vand.u32 2147483647, %v541_v35  ;;  %vm547_vm6 = vweird.f32 %v541_v35 }
 0x12e   : > { %v554_v43 = vor.u32 1.1754944e-38, %v553_v39  ;;  %vm552_vm8 = vcmp.eq.f32.partialorder %v551_v41, 8.507059e+37  ;;  %v1293_v39 = vunpack.c.l.bf16 %v1292_v21 }
 0x132   : > { %v1377_v36 = vpop.eup %1376 }
 0x133   : > { %v543_v37 = vmul.f32 %v1377_v36, %v541_v35  ;;  %vm548_vm5 = vweird.f32 %v1377_v36 }
 0x134   : > { %vm549_vm7 = vmor %vm547_vm6, %vm548_vm5 }
 0x135   : > { %v544_v38 = vsub.f32 1.0, %v543_v37 }
 0x137   : > { %v545_v40 = vmul.f32 %v1377_v36, %v544_v38 }
 0x139   : > { %v546_v42 = vadd.f32 %v1377_v36, %v545_v40 }
 0x13b   : > { %v550_v44 = vsel %vm549_vm7, %v1377_v36, %v546_v42  ;;  %v1297_v36 = vunpack.c.l.bf16 %v1299_v15 }
 0x13c   : > { %v555_v46 = vsel %vm552_vm8, %v554_v43, %v550_v44 }
 0x13d   : > { %v556_v47 = vmul.f32 %v555_v46, %v516_v11 }
 0x13f   : > { %v560_v49 = vmul.f32 %v1362_v45, %v556_v47 }
 0x141   : > { %v564_v50 = vadd.f32 %v1363_v48, %v560_v49 }
 0x143   : > { %v565_v51 = vpack.c.bf16 %v564_v50, %v564_v50 }
 0x145   : > { %1213 = vmatmul.msk.bf16.vlgmr.msra.gmra.mxu0 %vm504_vm0, %v565_v51 }
 0x1c2   : > { %v598_v53 = vpop.f32.mrf.mxu0 }
 0x1c3   : > { %v599_v54 = vadd.f32 %v1364_v52, %v598_v53 }
 0x1c5   : > { %v602_v55 = vpack.c.bf16 %v599_v54, %v599_v54 }
 0x1c7   : > { %608 = vrot.lane.b32.xlu2 %v602_v55, %s1503_s27  ;;  %604 = vrot.lane.b32.xlu1 %v602_v55, %s1504_s18  ;;  %v610_v63 = vunpack.c.l.b16 %v602_v55  ;;  %s1508_s27 = smov 8   ;;  %s1509_s18 = smov 24  }
 0x1c9   : > { %v1685_v4 = vpack.c.b16 %v610_v63, %v610_v63 }
 0x1ca   : > { %v600_v56 = vpop.f32.mrf.mxu0 }
 0x1cf   : > { %606 = vrot.lane.b32.xlu1 %v602_v55, %s1505_s20  ;;  %s1510_s20 = smov 16  }
 0x221   : > { %v609_v57 = vpop.permute.xlu2 %608 }
 0x222   : > { %v680_v58 = vunpack.c.l.b16 %v609_v57 }
 0x224   : > { %v1680_v59 = vpack.c.b16 %v680_v58, %v680_v58 }
 0x226   : > { %682 = vrot.lane.b32.xlu1 %v1680_v59, %s1506_s21 }
 0x239   : > { %v605_v60 = vpop.permute.xlu1 %604 }
 0x23a   : > { %v634_v61 = vunpack.c.l.b16 %v605_v60 }
 0x23c   : > { %v635_v62 = vpack.c.b16 %v634_v61, %v634_v61 }
 0x23e   : > { %636 = vrot.lane.b32.xlu2 %v635_v62, %s1506_s21 }
 0x241   : > { %v607_v1 = vpop.permute.xlu1 %606 }
 0x242   : > { %v657_v2 = vunpack.c.l.b16 %v607_v1 }
 0x244   : > { %v1683_v3 = vpack.c.b16 %v657_v2, %v657_v2 }
 0x246   : > { %659 = vrot.lane.b32.xlu0 %v1683_v3, %s1506_s21  ;;  %612 = vrot.lane.b32.xlu2 %v1685_v4, %s1506_s21  ;;  %s1201_s21 = sshll.u32 %s488_s0, 3 }
 0x298   : > { %v637_v5 = vpop.permute.xlu2 %636  ;;  %v683_v6 = vpop.permute.xlu1 %682 }
 0x299   : > { %v642_v7 = vsel %vm614_vm9, %v637_v5, 0  ;;  %v688_v9 = vsel %vm614_vm9, %v683_v6, 0 }
 0x29a   : > { %651 = vmatpush.bf16.xpose.msra.mxu2 %v642_v7  ;;  %697 = vmatpush.bf16.xpose.msrb.mxu0 %v688_v9 }
 0x2a0   : > { %v613_v10 = vpop.permute.xlu2 %612 }
 0x2a1   : > { %1215 = vmatmul.msk.bf16.vlgmr.msra.gmra.mxu2 %vm614_vm9, %v605_v60  ;;  %1217 = vmatmul.msk.bf16.vlgmr.msrb.gmra.mxu0 %vm614_vm9, %v609_v57  ;;  %v619_v11 = vsel %vm614_vm9, %v613_v10, 0 }
 0x2a2   : > { %628 = vmatpush.bf16.xpose.msra.mxu1 %v619_v11 }
 0x2a9   : > { %1214 = vmatmul.msk.bf16.vlgmr.msra.gmra.mxu1 %vm614_vm9, %v602_v55 }
 0x2b8   : > { %v660_v12 = vpop.permute.xlu0 %659 }
 0x2b9   : > { %v665_v13 = vsel %vm614_vm9, %v660_v12, 0 }
 0x2ba   : > { %674 = vmatpush.bf16.xpose.msra.mxu3 %v665_v13 }
 0x2c1   : > { %1216 = vmatmul.msk.bf16.vlgmr.msra.gmra.mxu3 %vm614_vm9, %v607_v1 }
 0x31e   : > { %v699_v19 = vpop.f32.mrf.mxu0 }
 0x31f   : > { %v719_v20 = vmul.f32 0.35355338, %v699_v19 }
 0x321   : > { %v723_v23 = vadd.f32 %v1298_v18, %v719_v20 }
 0x323   : > { %v729_v25 = vsel %vm715_vm10, %v723_v23, -1e+10 }
 0x324   : > { %v653_v26 = vpop.f32.mrf.mxu2  ;;  %v739_v27 = vsel %vm614_vm9, %v729_v25, -inf }
 0x325   : > { %v717_v28 = vmul.f32 0.35355338, %v653_v26  ;;  %740 = vmax.xlane.f32.xlu0 %v739_v27 }
 0x326   : > { %v630_v29 = vpop.f32.mrf.mxu1  ;;  %v701_v30 = vpop.f32.mrf.mxu0 }
 0x327   : > { %v721_v31 = vadd.f32 %v1294_v24, %v717_v28  ;;  %v716_v40 = vmul.f32 0.35355338, %v630_v29 }
 0x329   : > { %v727_v32 = vsel %vm715_vm10, %v721_v31, -1e+10  ;;  %v720_v44 = vadd.f32 %v1293_v39, %v716_v40  ;;  %v1280_v39 = vld [vmem:[%s1825_s6 + $0x8] sm:$0xff]  ;;  %v1279_v40 = vld [vmem:[%s1825_s6] sm:$0xff] }
 0x32a   : > { %v733_v33 = vsel %vm614_vm9, %v727_v32, -inf }
 0x32b   : > { %734 = vmax.xlane.f32.xlu1 %v733_v33  ;;  %v726_v46 = vsel %vm715_vm10, %v720_v44, -1e+10 }
 0x32c   : > { %v655_v34 = vpop.f32.mrf.mxu2  ;;  %v730_v47 = vsel %vm614_vm9, %v726_v46, -inf }
 0x32e   : > { %v632_v35 = vpop.f32.mrf.mxu1 }
 0x339   : > { %800 = vrot.lane.b32.xlu0 %v635_v62, %s1507_s25 }
 0x344   : > { %v676_v37 = vpop.f32.mrf.mxu3 }
 0x345   : > { %v718_v38 = vmul.f32 0.35355338, %v676_v37 }
 0x347   : > { %v722_v41 = vadd.f32 %v1297_v36, %v718_v38 }
 0x349   : > { %v728_v42 = vsel %vm715_vm10, %v722_v41, -1e+10 }
 0x34a   : > { %v736_v43 = vsel %vm614_vm9, %v728_v42, -inf }
 0x34b   : > { %737 = vmax.xlane.f32.xlu2 %v736_v43 }
 0x34c   : > { %v678_v45 = vpop.f32.mrf.mxu3 }
 0x353   : > { %731 = vmax.xlane.f32.xlu2 %v730_v47 }
 0x398   : > { %v741_v48 = vpop.xlane.xlu0 %740 }
 0x399   : > { %v745_v49 = vsub.f32 %v729_v25, %v741_v48  ;;  %v1365_v48 = vld [vmem:[%s1826_s7] ss:$0 sm:$0xff] }
 0x39b   : > { %v752_v50 = vmul.f32 1.442695, %v745_v49 }
 0x39d   : > { %1378 = vpow2.f32 %v752_v50 }
 0x39e   : > { %v735_v51 = vpop.xlane.xlu1 %734 }
 0x39f   : > { %v743_v52 = vsub.f32 %v727_v32, %v735_v51 }
 0x3a1   : > { %v748_v53 = vmul.f32 1.442695, %v743_v52 }
 0x3a3   : > { %v1379_v54 = vpop.eup %1378  ;;  %1380 = vpow2.f32 %v748_v53 }
 0x3a4   : > { %v763_v55 = vsel %vm614_vm9, %v1379_v54, 0.0 }
 0x3a5   : > { %764 = vadd.xlane.f32.xlu1 %v763_v55 }
 0x3a9   : > { %v1381_v56 = vpop.eup %1380 }
 0x3aa   : > { %v757_v60 = vsel %vm614_vm9, %v1381_v56, 0.0 }
 0x3ab   : > { %v801_v57 = vpop.permute.xlu0 %800 }
 0x3ac   : > { %v806_v58 = vsel %vm783_vm11, %v801_v57, 0 }
 0x3ad   : > { %815 = vmatpush.bf16.msrb.mxu2 %v806_v58  ;;  %758 = vadd.xlane.f32.xlu1 %v757_v60  ;;  %v1282_v60 = vld [vmem:[#allocation2 + $0x8] sm:$0xff] }
 0x3b1   : > { %996 = vmatpush.bf16.msra.mxu2 %v1282_v60 }
 0x3be   : > { %v738_v61 = vpop.xlane.xlu2 %737 }
 0x3bf   : > { %v744_v62 = vsub.f32 %v728_v42, %v738_v61  ;;  %v1281_v61 = vld [vmem:[#allocation2] sm:$0xff] }
 0x3c0   : > { %997 = vmatpush.bf16.msra.mxu2 %v1281_v61 }
 0x3c1   : > { %v750_v63 = vmul.f32 1.442695, %v744_v62 }
 0x3c3   : > { %1382 = vpow2.f32 %v750_v63 }
 0x3c6   : > { %842 = vrot.lane.b32.xlu1 %v1680_v59, %s1507_s25  ;;  %v732_v1 = vpop.xlane.xlu2 %731 }
 0x3c7   : > { %v742_v2 = vsub.f32 %v726_v46, %v732_v1 }
 0x3c9   : > { %v1383_v5 = vpop.eup %1382  ;;  %v746_v6 = vmul.f32 1.442695, %v742_v2 }
 0x3ca   : > { %v760_v7 = vsel %vm614_vm9, %v1383_v5, 0.0 }
 0x3cb   : > { %1384 = vpow2.f32 %v746_v6  ;;  %761 = vadd.xlane.f32.xlu2 %v760_v7  ;;  %v1290_v7 = vld [vmem:[%s1831_s12 + $0x38] sm:$0xff] }
 0x3d1   : > { %v1385_v9 = vpop.eup %1384 }
 0x3d2   : > { %v754_v10 = vsel %vm614_vm9, %v1385_v9, 0.0 }
 0x3d3   : > { %755 = vadd.xlane.f32.xlu0 %v754_v10 }
 0x3e3   : > { %821 = vrot.lane.b32.xlu2 %v1683_v3, %s1507_s25 }
 0x3eb   : > { %778 = vrot.lane.b32.xlu2 %v1685_v4, %s1507_s25 }
 0x418   : > { %v765_v11 = vpop.xlane.xlu1 %764 }
 0x420   : > { %v759_v59 = vpop.xlane.xlu1 %758 }
 0x421   : > { %1386 = vrcp.f32 %v759_v59 }
 0x422   : > { %1388 = vrcp.f32 %v765_v11  ;;  %v1289_v11 = vld [vmem:[%s1831_s12 + $0x30] sm:$0xff] }
 0x427   : > { %v1387_v12 = vpop.eup %1386 }
 0x428   : > { %v771_v13 = vmul.f32 %v1387_v12, %v1381_v56  ;;  %v1389_v15 = vpop.eup %1388 }
 0x429   : > { %v773_v16 = vmul.f32 %v1389_v15, %v1379_v54 }
 0x42a   : > { %v775_v14 = vpack.c.bf16 %v771_v13, %v771_v13 }
 0x42b   : > { %v777_v19 = vpack.c.bf16 %v773_v16, %v773_v16 }
 0x42c   : > { %1219 = vmatmul.msk.bf16.vlgmr.msrb.gmra.mxu2 %vm614_vm9, %v775_v14 }
 0x438   : > { %v843_v17 = vpop.permute.xlu1 %842 }
 0x439   : > { %v848_v18 = vsel %vm783_vm11, %v843_v17, 0 }
 0x43a   : > { %857 = vmatpush.bf16.msra.mxu0 %v848_v18 }
 0x43d   : > { %1221 = vmatmul.msk.bf16.vlgmr.msra.gmra.mxu0 %vm614_vm9, %v777_v19 }
 0x43e   : > { %v762_v3 = vpop.xlane.xlu2 %761 }
 0x43f   : > { %1390 = vrcp.f32 %v762_v3 }
 0x445   : > { %v1391_v4 = vpop.eup %1390 }
 0x446   : > { %v772_v20 = vmul.f32 %v1391_v4, %v1383_v5  ;;  %v756_v21 = vpop.xlane.xlu0 %755  ;;  %v822_v23 = vpop.permute.xlu2 %821 }
 0x447   : > { %1392 = vrcp.f32 %v756_v21  ;;  %v827_v24 = vsel %vm783_vm11, %v822_v23, 0 }
 0x448   : > { %836 = vmatpush.bf16.msrb.mxu3 %v827_v24  ;;  %v776_v25 = vpack.c.bf16 %v772_v20, %v772_v20  ;;  %v1366_v20 = vld [vmem:[%s1827_s8] ss:$0 sm:$0xff] }
 0x449   : > { %v1367_v24 = vld [vmem:[%s1828_s9] ss:$0 sm:$0xff] }
 0x44b   : > { %1220 = vmatmul.msk.bf16.vlgmr.msrb.gmra.mxu3 %vm614_vm9, %v776_v25 }
 0x44c   : > { %1081 = vmatpush.bf16.msra.mxu3 %v1290_v7 }
 0x44d   : > { %v1393_v26 = vpop.eup %1392 }
 0x44e   : > { %v770_v27 = vmul.f32 %v1393_v26, %v1385_v9  ;;  %v779_v28 = vpop.permute.xlu2 %778 }
 0x44f   : > { %v785_v29 = vsel %vm783_vm11, %v779_v28, 0  ;;  %v1288_v28 = vld [vmem:[%s1831_s12 + $0x28] sm:$0xff] }
 0x450   : > { %v774_v30 = vpack.c.bf16 %v770_v27, %v770_v27  ;;  %794 = vmatpush.bf16.msrb.mxu1 %v785_v29  ;;  %1082 = vmatpush.bf16.msra.mxu3 %v1289_v11  ;;  %v1287_v29 = vld [vmem:[%s1831_s12 + $0x20] sm:$0xff] }
 0x453   : > { %1218 = vmatmul.msk.bf16.vlgmr.msrb.gmra.mxu1 %vm614_vm9, %v774_v30  ;;  %v1286_v30 = vld [vmem:[%s1831_s12 + $0x18] sm:$0xff] }
 0x454   : > { %910 = vmatpush.bf16.msra.mxu1 %v1280_v39  ;;  %1083 = vmatpush.bf16.msra.mxu3 %v1288_v28 }
 0x458   : > { %911 = vmatpush.bf16.msra.mxu1 %v1279_v40  ;;  %1084 = vmatpush.bf16.msra.mxu3 %v1287_v29 }
 0x45c   : > { %1085 = vmatpush.bf16.msra.mxu3 %v1286_v30 }
 0x4af   : > { %v817_v31 = vpop.f32.mrf.mxu2 }
 0x4b0   : > { %864 = vrot.lane.b32.xlu1 %v817_v31, %s1508_s27  ;;  %v1285_v31 = vld [vmem:[%s1831_s12 + $0x10] sm:$0xff]  ;;  %s1107_s27 = scalar_lea.hbm %s1833_s14, %s1273_s26 }
 0x4b1   : > { %1086 = vmatpush.bf16.msra.mxu3 %v1285_v31  ;;  %s1111_s1 = sshll.u32 %s1107_s27, 4  ;;  %s1112_s1 = int_to_ptr.hbm [resolvable:$true] %s1111_s1 }
 0x4b2   : > { %s1444_s2 = sshra.s32 %s1112_s1, 4  ;;  %s1445_s2 = int_to_ptr.hbm [resolvable:$true] %s1444_s2 }
 0x4b3   : > { %s1446_s28 = scalar_lea.hbm %s1445_s2, 8  ;;  %p1451_p3 = scmp.lt.s32.totalorder %s1445_s2, %s1833_s14 }
 0x4b4   : > { %p1447_p0 = scmp.ne.s32.totalorder %s1445_s2, %s1446_s28 }
 0x4b6   : > { %p1448_p1 = pnand %p1447_p0, %p1624_p5 }
 0x4b7   : > { %v819_v32 = vpop.f32.mrf.mxu2 }
 0x4b8   : > { %v1284_v32 = vld [vmem:[%s1831_s12 + $0x8] sm:$0xff]  ;;  %p1449_p2 = pneg %p1448_p1 }
 0x4b9   : > { %1087 = vmatpush.bf16.msra.mxu3 %v1284_v32 }
 0x4ba   : > { %v859_v33 = vpop.f32.mrf.mxu0 }
 0x4bb   : > { %872 = vrot.lane.b32.xlu1 %v859_v33, %s1509_s18  ;;  %v1283_v33 = vld [vmem:[%s1831_s12] sm:$0xff]  ;;  %s490_s18 = scalar_lea.vmem [#allocation5], %s1201_s21  ;;  %s1450_s21 = scalar_lea.hbm %s1833_s14, 16 }
 0x4bc   : > { %p1452_p4 = scmp.lt.s32.totalorder %s1450_s21, %s1446_s28 }
 0x4bd   : > { %1088 = vmatpush.bf16.msra.mxu3 %v1283_v33 }
 0x4be   : > { %p1453_p7 = por %p1452_p4, %p1451_p3 }
 0x4c0   : > { %p1454_p8 = pnand %p1453_p7, %p1449_p2 }
 0x4c2   : > { %v861_v34 = vpop.f32.mrf.mxu0 }
 0x4c3   : > { %v1368_v34 = vld [vmem:[%s1830_s11] ss:$0 sm:$0xff] }
 0x4ce   : > { %v838_v35 = vpop.f32.mrf.mxu3 }
 0x4cf   : > { %868 = vrot.lane.b32.xlu2 %v838_v35, %s1510_s20  ;;  %s1109_s20 = sshll.u32 %s490_s18, 4  ;;  %s1110_s20 = int_to_ptr.vmem [resolvable:$true] %s1109_s20 }
 0x4d0   : > { %v796_v36 = vpop.f32.mrf.mxu1 }
 0x4d6   : > { %v840_v37 = vpop.f32.mrf.mxu3 }
 0x4d8   : > { %v798_v38 = vpop.f32.mrf.mxu1 }
 0x522   : > { %v865_v41 = vpop.permute.xlu1 %864 }
 0x523   : > { %v875_v43 = vsel %vm614_vm9, %v796_v36, %v865_v41 }
 0x529   : > { %v869_v42 = vpop.permute.xlu2 %868 }
 0x52a   : > { %v877_v44 = vsel %vm876_vm12, %v875_v43, %v869_v42 }
 0x52d   : > { %v873_v45 = vpop.permute.xlu1 %872 }
 0x52e   : > { %v879_v46 = vsel %vm878_vm13, %v877_v44, %v873_v45 }
 0x52f   : > { %v880_v47 = vpack.c.bf16 %v879_v46, %v879_v46 }
 0x531   : > { %1230 = vmatmul.msk.bf16.vlgmr.msra.gmra.mxu1 %vm504_vm0, %v880_v47 }
 0x5ae   : > { %v913_v49 = vpop.f32.mrf.mxu1 }
 0x5af   : > { %v914_v50 = vadd.f32 %v1365_v48, %v913_v49  ;;  %v1369_v48 = vld [vmem:[%s1832_s13] ss:$0 sm:$0xff] }
 0x5b1   : > { %v1740_v51 = vadd.f32 %v914_v50, %v1652_v0 }
 0x5b3   : > { %v920_v52 = vsel %vm504_vm0, %v1740_v51, 0.0 }
 0x5b4   : > { %921 = vadd.xlane.f32.xlu2 %v920_v52 }
 0x5b6   : > { %v915_v53 = vpop.f32.mrf.mxu1 }
 0x627   : > { %v922_v54 = vpop.xlane.xlu2 %921 }
 0x628   : > { %v923_v55 = vmul.f32 %v922_v54, %v1656_v8 }
 0x62a   : > { %v924_v56 = vsub.f32 %v1740_v51, %v923_v55 }
 0x62c   : > { %v925_v57 = vmul.f32 %v924_v56, %v924_v56 }
 0x62e   : > { %v926_v58 = vsel %vm504_vm0, %v925_v57, 0.0 }
 0x62f   : > { %927 = vadd.xlane.f32.xlu1 %v926_v58 }
 0x6a2   : > { %v928_v62 = vpop.xlane.xlu1 %927 }
 0x6a3   : > { %v929_v0 = vmul.f32 %v928_v62, %v1667_v22 }
 0x6a5   : > { %1394 = vrsqrt.f32 %v929_v0  ;;  %vm937_vm14 = vcmp.eq.f32.partialorder %v929_v0, inf  ;;  %v940_v10 = vand.u32 2147483648, %v929_v0  ;;  %vm939_vm15 = vcmp.eq.f32.partialorder %v929_v0, 0.0 }
 0x6ab   : > { %v1395_v63 = vpop.eup %1394 }
 0x6ac   : > { %v931_v1 = vmul.f32 %v1395_v63, %v929_v0 }
 0x6ae   : > { %v932_v2 = vmul.f32 %v1395_v63, %v931_v1 }
 0x6b0   : > { %v933_v5 = vmul.f32 0.5, %v932_v2 }
 0x6b2   : > { %v934_v6 = vsub.f32 1.5, %v933_v5 }
 0x6b4   : > { %v935_v8 = vmul.f32 %v1395_v63, %v934_v6 }
 0x6b6   : > { %v936_v9 = vmul.f32 %v935_v8, %v929_v0 }
 0x6b8   : > { %v938_v22 = vsel %vm937_vm14, %v929_v0, %v936_v9 }
 0x6b9   : > { %v941_v59 = vsel %vm939_vm15, %v940_v10, %v938_v22 }
 0x6ba   : > { %v942_v12 = vadd.f32 1e-06, %v941_v59 }
 0x6bc   : > { %1396 = vrcp.f32 %v942_v12  ;;  %v954_v16 = vand.u32 2147483648, %v942_v12  ;;  %v952_v18 = vand.u32 2147483647, %v942_v12  ;;  %vm948_vm2 = vweird.f32 %v942_v12 }
 0x6be   : > { %v955_v3 = vor.u32 1.1754944e-38, %v954_v16  ;;  %vm953_vm4 = vcmp.eq.f32.partialorder %v952_v18, 8.507059e+37 }
 0x6c2   : > { %v1397_v13 = vpop.eup %1396 }
 0x6c3   : > { %v944_v14 = vmul.f32 %v1397_v13, %v942_v12  ;;  %vm949_vm1 = vweird.f32 %v1397_v13 }
 0x6c4   : > { %vm950_vm3 = vmor %vm948_vm2, %vm949_vm1 }
 0x6c5   : > { %v945_v15 = vsub.f32 1.0, %v944_v14 }
 0x6c7   : > { %v946_v17 = vmul.f32 %v1397_v13, %v945_v15 }
 0x6c9   : > { %v947_v19 = vadd.f32 %v1397_v13, %v946_v17 }
 0x6cb   : > { %v951_v4 = vsel %vm950_vm3, %v1397_v13, %v947_v19 }
 0x6cc   : > { %v956_v21 = vsel %vm953_vm4, %v955_v3, %v951_v4 }
 0x6cd   : > { %v957_v23 = vmul.f32 %v956_v21, %v924_v56 }
 0x6cf   : > { %v961_v25 = vmul.f32 %v1366_v20, %v957_v23 }
 0x6d1   : > { %v965_v26 = vadd.f32 %v1367_v24, %v961_v25 }
 0x6d3   : > { %v966_v27 = vpack.c.bf16 %v965_v26, %v965_v26 }
 0x6d5   : > { %1239 = vmatmul.msk.bf16.vlgmr.msra.gmra.mxu2 %vm504_vm0, %v966_v27 }
 0x758   : > { %v999_v35 = vpop.f32.mrf.mxu2 }
 0x759   : > { %v1000_v36 = vadd.f32 %v1368_v34, %v999_v35 }
 0x75b   : > { %v1004_v37 = vmul.f32 0.044715, %v1000_v36  ;;  %v1003_v44 = vmul.f32 0.5, %v1000_v36 }
 0x75d   : > { %v1005_v38 = vmul.f32 %v1004_v37, %v1000_v36 }
 0x75f   : > { %v1006_v39 = vmul.f32 %v1005_v38, %v1000_v36 }
 0x760   : > { %v1001_v40 = vpop.f32.mrf.mxu2 }
 0x761   : > { %v1007_v41 = vadd.f32 %v1006_v39, %v1000_v36 }
 0x763   : > { %v1008_v42 = vmul.f32 0.7978846, %v1007_v41 }
 0x765   : > { %1398 = vtanh.f32 %v1008_v42 }
 0x76b   : > { %v1399_v43 = vpop.eup %1398 }
 0x76c   : > { %v1010_v45 = vadd.f32 1.0, %v1399_v43 }
 0x76e   : > { %v1011_v46 = vmul.f32 %v1010_v45, %v1003_v44 }
 0x770   : > { %v1012_v47 = vpack.c.bf16 %v1011_v46, %v1011_v46 }
 0x772   : > { %1089 = vmatmul.bf16.vlgmr.msra.gmra.mxu3 %v1012_v47 }
 0x7f5   : > { %v1090_v49 = vpop.f32.mrf.mxu3 }
 0x7f6   : > { %v1091_v50 = vadd.f32 %v1369_v48, %v1090_v49 }
 0x7f8   : > { %v1094_v52 = vadd.f32 %v1091_v50, %v1740_v51 }
 0x7fa   : > { %1095 = vst.msk [vmem:[%s490_s18] sm:$0xff] %vm504_vm0, %v1094_v52 }
 0x7fb   : > { %1457 = shalt.err (!%p1454_p8)
}
 0x7fc   : > { %1304 = dma.vmem_to_hbm [thread:$0]  (%p1624_p5), %s1110_s20, 128, %s1112_s1, %s1097_s17  }
 0x7fd   : > { %v1092_v51 = vpop.f32.mrf.mxu3 }
 0x7fe PF: > { %p1316_p9 = scmp.ge.s32.totalorder %s1496_s16, 2  ;;  %s1123_s0 = sand.u32 1, %s1484_s29  }
 0x7ff   : > { %s1124_s27 = scalar_lea.sflag [#allocation4], %s1123_s0 }
 0x800   : > { %p1311_p10 = pnand %p1316_p9, %p1628_p6 }
 0x802   : > { %p1312_p11 = pneg %p1311_p10 }
 0x804   : > { %1479 = dma.done.wait (%p1312_p11), %s1124_s27, 128  }
 0x805   : > { %1481 = vsyncadd (%p1312_p11), %s1124_s27, 4294967168  ;;  %s1845_s2 = sld [smem:[#allocation8_spill]]  ;;  %p25_p12 = scmp.ge.s32.totalorder %s1611_s19, 4  }
 0x806   : > { %s1846_s29 = smov %s1488_s30  ;;  %s1847_s30 = smov %s1492_s15 }
 0x807   : > { %s1849_s16 = smov %s1611_s19  ;;  %27 = sbr.rel (!%p25_p12) target bundleno = 9 (0x9), region = 119 }
 0x80b   : > { %s1848_s15 = smov %s1845_s2 }
 0x80c   :  { %1130 = vsyncpa [#allocation3], 1 }
 0x80d   :  { %1132 = vsyncpa [#allocation3 + $0x1], 1 }
 0x80e   :  { %1133 = vsyncpa [#allocation4], 1 }
 0x80f   :  { %1135 = vsyncpa [#allocation4 + $0x1], 1 }

</bundles_post_ra>
